<compile_context>
chip_gen: v6e
topology: v6e:2x2x1
jax: 0.10.0
libtpu: 0.0.40
codegen_flags: <defaults>
</compile_context>

<pallas_src>
import jax
import jax.numpy as jnp
from jax.experimental import pallas as pl
from jax.experimental.pallas import tpu as pltpu


def _rup(x, m):
    return -(-x // m) * m


def _block_bytes(shape, dtype):
    """VMEM footprint of a block: minor dims padded to (8*(4/itemsize), 128)."""
    it = jnp.dtype(dtype).itemsize
    sub = 8 * max(1, 4 // it)                     # f32 -> 8, bf16 -> 16, int8 -> 32
    lead = 1
    for d in shape[:-2]:
        lead *= int(d)
    return lead * _rup(int(shape[-2]), sub) * _rup(int(shape[-1]), 128) * it


def _tile_bytes(th, W, Cin, Cout, op_dtype, out_dtype):
    """Per-grid-step VMEM: double-buffered blocks + weights + kernel intermediates."""
    inb = _block_bytes((1, th, W, Cin), op_dtype)
    hb = _block_bytes((1, 1, W, Cin), op_dtype)
    outb = _block_bytes((1, th, 2, W, 2 * Cout), out_dtype)
    wb = (_block_bytes((4 * Cin, 4 * Cout), op_dtype)
          + _block_bytes((1, 4 * Cout), jnp.float32))
    scratch = (_block_bytes((th * W, 4 * Cin), op_dtype)        # im2col lhs
               + _block_bytes((th * W, 4 * Cout), jnp.float32)  # f32 accumulator
               + 3 * _block_bytes((th, W, Cin), op_dtype)       # shifted tap copies
               + 2 * _block_bytes((th, W, 2 * Cout), out_dtype))
    return 2 * (inb + hb + outb) + 2 * wb + scratch


def _device_caps():
    """(per-tile VMEM budget, vmem_limit cap) tuned per TPU generation."""
    kind = ""
    try:
        kind = jax.devices()[0].device_kind.lower()
    except Exception:
        pass
    if any(s in kind for s in ("v4", "v5 lite", "v5e", "v5lite", "v6 lite", "v6e")):
        return 14 << 20, 96 << 20   # 128 MiB physical VMEM: larger tiles/limit
    return 8 << 20, 48 << 20        # safe for v7x (64 MiB VMEM) and unknown chips


def _pick_tile_h(N, H, W, Cin, Cout, op_dtype, out_dtype, budget):
    """Largest divisor of H fitting the VMEM budget; keep >=2 grid units for megacore."""
    best = 1
    for th in range(1, H + 1):
        if H % th != 0:
            continue
        if N == 1 and th > max(1, H // 2):      # v7x: don't leave one TensorCore idle
            continue
        if _tile_bytes(th, W, Cin, Cout, op_dtype, out_dtype) <= budget:
            best = th
    return best


def _pack_weights(wt, scale):
    """Fused polyphase weight (4*Cin, 4*Cout); rows = taps (p00, p01, p10, p11),
    columns = (a, b, cout) with eval-BN scale folded in.

    Output pixel (2i+a, 2j+b, co):
      (0,0): x[i,j]*w[1,1]
      (0,1): x[i,j]*w[1,2] + x[i,j+1]*w[1,0]
      (1,0): x[i,j]*w[2,1] + x[i+1,j]*w[0,1]
      (1,1): x[i,j]*w[2,2] + x[i,j+1]*w[2,0] + x[i+1,j]*w[0,2] + x[i+1,j+1]*w[0,0]
    """
    Cin, Cout = wt.shape[0], wt.shape[1]
    z = jnp.zeros((Cin, Cout), wt.dtype)
    w_f = jnp.concatenate([
        jnp.concatenate([wt[:, :, 1, 1], wt[:, :, 1, 2],
                         wt[:, :, 2, 1], wt[:, :, 2, 2]], axis=1),   # tap x[i,   j  ]
        jnp.concatenate([z,              wt[:, :, 1, 0],
                         z,              wt[:, :, 2, 0]], axis=1),   # tap x[i,   j+1]
        jnp.concatenate([z,              z,
                         wt[:, :, 0, 1], wt[:, :, 0, 2]], axis=1),   # tap x[i+1, j  ]
        jnp.concatenate([z,              z,
                         z,              wt[:, :, 0, 0]], axis=1),   # tap x[i+1, j+1]
    ], axis=0)                                                        # (4*Cin, 4*Cout)
    return w_f * jnp.tile(scale, 4)[None, :]


def upsampler_kernel(x_ref, xh_ref, w_ref, sh_ref, o_ref):
    # x_ref : (1, TH, W, Cin)       input rows [t*TH, (t+1)*TH)
    # xh_ref: (1, 1,  W, Cin)       input row (t+1)*TH (index clamped; zeroed on last tile)
    # w_ref : (4*Cin, 4*Cout)       fused polyphase taps, BN scale folded, cols = (a, b, co)
    # sh_ref: (1, 4*Cout)           folded BN shift (f32), tiled over (a, b)
    # o_ref : (1, TH, 2, W, 2*Cout) dim 2 = output-row parity a; last dim packs (b, co)
    th, w, cin = x_ref.shape[1], x_ref.shape[2], x_ref.shape[3]
    c2 = o_ref.shape[4]                                        # 2 * Cout

    x = x_ref[0]                                               # (TH, W, Cin)

    # Bottom halo row: real next row, or zeros for the last row-tile (no host pad).
    not_last = (pl.program_id(1) != pl.num_programs(1) - 1).astype(jnp.float32)
    xrow = (xh_ref[0].astype(jnp.float32) * not_last).astype(x.dtype)   # (1, W, Cin)

    if th > 1:
        x_dn = jnp.concatenate([x[1:], xrow], axis=0)          # x[i+1, j]
    else:
        x_dn = xrow

    # Right halo column is zero (transposed-conv padding / output_padding side).
    zcol = jnp.zeros((th, 1, cin), x.dtype)
    p01 = jnp.concatenate([x[:, 1:, :], zcol], axis=1)         # x[i,   j+1]
    p11 = jnp.concatenate([x_dn[:, 1:, :], zcol], axis=1)      # x[i+1, j+1]

    # im2col of the 2x2 input neighborhood along channels -> ONE fused MXU matmul
    # covering both output-row parities (K = 4*Cin, N = 4*Cout).
    lhs = jnp.concatenate([x, p01, x_dn, p11], axis=-1)        # (TH, W, 4*Cin)
    lhs = lhs.reshape(th * w, 4 * cin)   # free re-tiling when W is a sublane multiple

    y = jnp.dot(lhs, w_ref[...], preferred_element_type=jnp.float32)   # (TH*W, 4*Cout)
    y = jnp.maximum(y + sh_ref[...], 0.0).astype(o_ref.dtype)          # BN shift + ReLU

    # Parity-interleaved stores on a leading block dim: full (W, 2*Cout) slabs,
    # no in-kernel relayout, lane-dense whenever 2*Cout is a multiple of 128.
    o_ref[0, :, 0] = y[:, :c2].reshape(th, w, c2)              # even output rows 2i
    o_ref[0, :, 1] = y[:, c2:].reshape(th, w, c2)              # odd  output rows 2i+1


def upsampler_block(x_nchw, wt, bias, gamma, beta, run_mean, run_var, eps=1e-3,
                    tile_h=None, compute_dtype=None, return_nchw=True):
    """Forward of UpsamplerBlock (eval-mode BN).

    x_nchw: (N, Cin, H, W); wt: ConvTranspose2d weight (Cin, Cout, 3, 3).
    compute_dtype: MXU operand dtype; default bfloat16 for f32 inputs (f32 accumulation
                   and f32 BN/ReLU epilogue regardless).
    return_nchw=False returns NHWC and skips the final (only remaining) HBM transpose.
    """
    N, Cin, H, W = x_nchw.shape
    Cout = wt.shape[1]

    # Fold eval-mode BatchNorm: y = conv(x) * scale + shift
    scale = gamma / jnp.sqrt(run_var + eps)                    # (Cout,)
    shift = (bias - run_mean) * scale + beta                   # (Cout,)

    if compute_dtype is None:
        compute_dtype = jnp.bfloat16 if x_nchw.dtype == jnp.float32 else x_nchw.dtype
    op_dtype = jnp.dtype(compute_dtype)
    out_dtype = x_nchw.dtype

    # NCHW -> NHWC (input is only 1/4 of the output bytes; no padding copy).
    x = jnp.transpose(x_nchw, (0, 2, 3, 1)).astype(op_dtype)   # (N, H, W, Cin)

    w_f = _pack_weights(wt, scale).astype(op_dtype)            # (4*Cin, 4*Cout)
    shift4 = jnp.tile(shift, 4)[None, :].astype(jnp.float32)   # (1, 4*Cout)

    budget, cap = _device_caps()
    TH = tile_h if tile_h is not None else _pick_tile_h(
        N, H, W, Cin, Cout, op_dtype, out_dtype, budget)
    if H % TH != 0:
        raise ValueError(f"tile_h={TH} must divide H={H}")

    footprint = _tile_bytes(TH, W, Cin, Cout, op_dtype, out_dtype)
    vmem_limit = int(min(max(footprint + (4 << 20), 32 << 20), cap))

    grid = (N, H // TH)
    # Halo: single row (t+1)*TH, clamped to H-1 (block size 1 -> block idx == row idx);
    # the kernel zero-masks it on the last row-tile.
    halo_map = lambda n, t: (n, jnp.minimum((t + 1) * TH, H - 1), 0, 0)

    res = pl.pallas_call(
        upsampler_kernel,
        out_shape=jax.ShapeDtypeStruct((N, H, 2, W, 2 * Cout), out_dtype),
        grid_spec=pltpu.PrefetchScalarGridSpec(
            num_scalar_prefetch=0,
            grid=grid,
            in_specs=[
                pl.BlockSpec((1, TH, W, Cin), lambda n, t: (n, t, 0, 0)),
                pl.BlockSpec((1, 1, W, Cin), halo_map),
                pl.BlockSpec((4 * Cin, 4 * Cout), lambda n, t: (0, 0)),
                pl.BlockSpec((1, 4 * Cout), lambda n, t: (0, 0)),
            ],
            out_specs=pl.BlockSpec((1, TH, 2, W, 2 * Cout),
                                   lambda n, t: (n, t, 0, 0, 0)),
        ),
        compiler_params=pltpu.CompilerParams(
            dimension_semantics=("parallel", "parallel"),
            vmem_limit_bytes=vmem_limit,
        ),
    )(x, x, w_f, shift4)

    # (N, H, 2, W, 2*Cout) is flattened NHWC [n, 2i+a, 2j+b, co]: reshape is free.
    out_nhwc = res.reshape(N, 2 * H, 2 * W, Cout)
    if not return_nchw:
        return out_nhwc
    # The only remaining HBM restream; downstream NHWC consumers should pass
    # return_nchw=False to skip it.
    return jnp.transpose(out_nhwc, (0, 3, 1, 2))


if __name__ == "__main__":
    key = jax.random.PRNGKey(0)
    k_x, k_w, k_b, k_g, k_be, k_m, k_v = jax.random.split(key, 7)

    N, Cin, Cout, H, W = 2, 4, 8, 16, 16
    eps = 1e-3

    x = jax.random.normal(k_x, (N, Cin, H, W), jnp.float32)
    # ConvTranspose2d.weight has shape (in_channel, out_channel, kH, kW)
    wt = jax.random.normal(k_w, (Cin, Cout, 3, 3), jnp.float32) * 0.1
    bias = jax.random.normal(k_b, (Cout,), jnp.float32) * 0.1
    gamma = 1.0 + 0.1 * jax.random.normal(k_g, (Cout,), jnp.float32)
    beta = 0.1 * jax.random.normal(k_be, (Cout,), jnp.float32)
    run_mean = 0.1 * jax.random.normal(k_m, (Cout,), jnp.float32)
    run_var = jax.nn.softplus(jax.random.normal(k_v, (Cout,), jnp.float32)) + 0.5

    # ---- reference (pure JAX, same ConvTranspose2d + eval-BN + ReLU semantics) ----
    x_nhwc = jnp.transpose(x, (0, 2, 3, 1))
    w_hwio = jnp.transpose(wt[:, :, ::-1, ::-1], (2, 3, 0, 1))
    ref_conv = jax.lax.conv_general_dilated(
        x_nhwc, w_hwio, window_strides=(1, 1),
        padding=((1, 2), (1, 2)), lhs_dilation=(2, 2),
        dimension_numbers=("NHWC", "HWIO", "NHWC"))
    ref = (ref_conv + bias - run_mean) / jnp.sqrt(run_var + eps) * gamma + beta
    ref = jnp.maximum(ref, 0.0)
    ref = jnp.transpose(ref, (0, 3, 1, 2))

    # ---- f32 MXU operands: strict check ----
    out_f32 = upsampler_block(x, wt, bias, gamma, beta, run_mean, run_var, eps,
                              tile_h=8, compute_dtype=jnp.float32)
    out_f32 = jax.block_until_ready(out_f32)
    assert out_f32.shape == (N, Cout, 2 * H, 2 * W), out_f32.shape
    err = float(jnp.max(jnp.abs(out_f32 - ref)))
    assert jnp.allclose(out_f32, ref, atol=1e-4, rtol=1e-4), err

    # ---- default path (bf16 MXU operands, f32 accumulation): loose check ----
    out_bf16 = upsampler_block(x, wt, bias, gamma, beta, run_mean, run_var, eps)
    out_bf16 = jax.block_until_ready(out_bf16)
    assert out_bf16.shape == (N, Cout, 2 * H, 2 * W), out_bf16.shape
    err_bf = float(jnp.max(jnp.abs(out_bf16 - ref)))
    assert jnp.allclose(out_bf16, ref, atol=1e-1, rtol=5e-2), err_bf

    print("KERNEL_OK")
</pallas_src>

<mosaic_0001>
module attributes {stable_mosaic.version = 11 : i64} {
  func.func @upsampler_kernel(%arg0: i32, %arg1: i32, %arg2: memref<1x8x16x4xf32, #tpu.memory_space<vmem>>, %arg3: memref<1x1x16x4xf32, #tpu.memory_space<vmem>>, %arg4: memref<16x32xf32, #tpu.memory_space<vmem>>, %arg5: memref<1x32xf32, #tpu.memory_space<vmem>>, %arg6: memref<1x8x2x16x16xf32, #tpu.memory_space<vmem>>) attributes {dimension_semantics = [#tpu.dimension_semantics<parallel>, #tpu.dimension_semantics<parallel>], iteration_bounds = array<i64: 2, 2>, scalar_prefetch = 0 : i64, scratch_operands = 0 : i64, tpu.core_type = #tpu.core_type<tc>, window_params = [{transform_indices = @transform_0, window_bounds = array<i64: 1, 8, 16, 4>}, {transform_indices = @transform_1, window_bounds = array<i64: 1, 1, 16, 4>}, {pipeline_mode = #tpu.pipeline_mode<synchronous>, transform_indices = @transform_2, window_bounds = array<i64: 16, 32>}, {pipeline_mode = #tpu.pipeline_mode<synchronous>, transform_indices = @transform_3, window_bounds = array<i64: 1, 32>}, {transform_indices = @transform_4, window_bounds = array<i64: 1, 8, 2, 16, 16>}]} {
    %c0 = arith.constant 0 : index
    %c0_0 = arith.constant 0 : index
    %c0_1 = arith.constant 0 : index
    %c0_2 = arith.constant 0 : index
    %0 = vector.load %arg2[%c0, %c0_0, %c0_1, %c0_2] : memref<1x8x16x4xf32, #tpu.memory_space<vmem>>, vector<1x8x16x4xf32>
    %1 = vector.shape_cast %0 : vector<1x8x16x4xf32> to vector<8x16x4xf32>
    %c1_i32 = arith.constant 1 : i32
    %2 = arith.cmpi ne, %arg1, %c1_i32 : i32
    %3 = arith.extui %2 : i1 to i32
    %4 = arith.sitofp %3 : i32 to f32
    %c0_3 = arith.constant 0 : index
    %c0_4 = arith.constant 0 : index
    %c0_5 = arith.constant 0 : index
    %c0_6 = arith.constant 0 : index
    %5 = vector.load %arg3[%c0_3, %c0_4, %c0_5, %c0_6] : memref<1x1x16x4xf32, #tpu.memory_space<vmem>>, vector<1x1x16x4xf32>
    %6 = vector.shape_cast %5 : vector<1x1x16x4xf32> to vector<1x16x4xf32>
    %7 = vector.broadcast %4 : f32 to vector<1x16x4xf32>
    %8 = arith.mulf %6, %7 : vector<1x16x4xf32>
    %9 = vector.extract_strided_slice %1 {offsets = [1, 0, 0], sizes = [7, 16, 4], strides = [1, 1, 1]} : vector<8x16x4xf32> to vector<7x16x4xf32>
    %10 = tpu.concatenate %9, %8 in 0 : vector<7x16x4xf32>, vector<1x16x4xf32> -> vector<8x16x4xf32>
    %cst = arith.constant 0.000000e+00 : f32
    %11 = vector.broadcast %cst : f32 to vector<8x1x4xf32>
    %12 = vector.extract_strided_slice %1 {offsets = [0, 1, 0], sizes = [8, 15, 4], strides = [1, 1, 1]} : vector<8x16x4xf32> to vector<8x15x4xf32>
    %13 = tpu.concatenate %12, %11 in 1 : vector<8x15x4xf32>, vector<8x1x4xf32> -> vector<8x16x4xf32>
    %14 = vector.extract_strided_slice %10 {offsets = [0, 1, 0], sizes = [8, 15, 4], strides = [1, 1, 1]} : vector<8x16x4xf32> to vector<8x15x4xf32>
    %15 = tpu.concatenate %14, %11 in 1 : vector<8x15x4xf32>, vector<8x1x4xf32> -> vector<8x16x4xf32>
    %16 = tpu.concatenate %1, %13, %10, %15 in 2 : vector<8x16x4xf32>, vector<8x16x4xf32>, vector<8x16x4xf32>, vector<8x16x4xf32> -> vector<8x16x16xf32>
    %17 = vector.shape_cast %16 : vector<8x16x16xf32> to vector<128x16xf32>
    %c0_7 = arith.constant 0 : index
    %c0_8 = arith.constant 0 : index
    %18 = vector.load %arg4[%c0_7, %c0_8] : memref<16x32xf32, #tpu.memory_space<vmem>>, vector<16x32xf32>
    %cst_9 = arith.constant dense<0.000000e+00> : vector<128x32xf32>
    %19 = tpu.matmul %17, %18, %cst_9 {dimension_numbers = #tpu.dot_dimension_numbers<[1], [0], [0], [1], [0, 0, 1, 1], [], []>} : vector<128x16xf32>, vector<16x32xf32>, vector<128x32xf32> -> vector<128x32xf32>
    %c0_10 = arith.constant 0 : index
    %c0_11 = arith.constant 0 : index
    %20 = vector.load %arg5[%c0_10, %c0_11] : memref<1x32xf32, #tpu.memory_space<vmem>>, vector<1x32xf32>
    %21 = vector.broadcast %20 : vector<1x32xf32> to vector<128x32xf32>
    %22 = arith.addf %19, %21 : vector<128x32xf32>
    %cst_12 = arith.constant 0.000000e+00 : f32
    %23 = vector.broadcast %cst_12 : f32 to vector<128x32xf32>
    %24 = arith.maximumf %22, %23 : vector<128x32xf32>
    %25 = vector.extract_strided_slice %24 {offsets = [0, 0], sizes = [128, 16], strides = [1, 1]} : vector<128x32xf32> to vector<128x16xf32>
    %26 = vector.shape_cast %25 : vector<128x16xf32> to vector<8x16x16xf32>
    %c0_13 = arith.constant 0 : index
    %c0_14 = arith.constant 0 : index
    %c0_15 = arith.constant 0 : index
    %c0_16 = arith.constant 0 : index
    %c0_17 = arith.constant 0 : index
    %27 = vector.load %arg6[%c0_13, %c0_14, %c0_15, %c0_16, %c0_17] : memref<1x8x2x16x16xf32, #tpu.memory_space<vmem>>, vector<1x8x1x16x16xf32>
    %28 = vector.shape_cast %27 : vector<1x8x1x16x16xf32> to vector<8x16x16xf32>
    %29 = vector.shape_cast %26 : vector<8x16x16xf32> to vector<1x8x1x16x16xf32>
    tpu.vector_store %arg6[%c0_13, %c0_14, %c0_15, %c0_16, %c0_17], %29 {strides = array<i32>} : memref<1x8x2x16x16xf32, #tpu.memory_space<vmem>>, vector<1x8x1x16x16xf32>,
    %30 = vector.extract_strided_slice %24 {offsets = [0, 16], sizes = [128, 16], strides = [1, 1]} : vector<128x32xf32> to vector<128x16xf32>
    %31 = vector.shape_cast %30 : vector<128x16xf32> to vector<8x16x16xf32>
    %c0_18 = arith.constant 0 : index
    %c0_19 = arith.constant 0 : index
    %c1 = arith.constant 1 : index
    %c0_20 = arith.constant 0 : index
    %c0_21 = arith.constant 0 : index
    %32 = vector.load %arg6[%c0_18, %c0_19, %c1, %c0_20, %c0_21] : memref<1x8x2x16x16xf32, #tpu.memory_space<vmem>>, vector<1x8x1x16x16xf32>
    %33 = vector.shape_cast %32 : vector<1x8x1x16x16xf32> to vector<8x16x16xf32>
    %34 = vector.shape_cast %31 : vector<8x16x16xf32> to vector<1x8x1x16x16xf32>
    tpu.vector_store %arg6[%c0_18, %c0_19, %c1, %c0_20, %c0_21], %34 {strides = array<i32>} : memref<1x8x2x16x16xf32, #tpu.memory_space<vmem>>, vector<1x8x1x16x16xf32>,
    return
  }
  func.func @transform_0(%arg0: i32, %arg1: i32) -> (i32, i32, i32, i32) {
    %c0_i32 = arith.constant 0 : i32
    %c0_i32_0 = arith.constant 0 : i32
    %c0_i32_1 = arith.constant 0 : i32
    return %arg0, %arg1, %c0_i32, %c0_i32_0 : i32, i32, i32, i32
  }
  func.func @transform_1(%arg0: i32, %arg1: i32) -> (i32, i32, i32, i32) {
    %c1_i32 = arith.constant 1 : i32
    %0 = arith.addi %arg1, %c1_i32 : i32
    %c8_i32 = arith.constant 8 : i32
    %1 = arith.muli %0, %c8_i32 : i32
    %c15_i32 = arith.constant 15 : i32
    %2 = arith.minsi %1, %c15_i32 : i32
    %c0_i32 = arith.constant 0 : i32
    %c0_i32_0 = arith.constant 0 : i32
    %c0_i32_1 = arith.constant 0 : i32
    return %arg0, %2, %c0_i32, %c0_i32_0 : i32, i32, i32, i32
  }
  func.func @transform_2(%arg0: i32, %arg1: i32) -> (i32, i32) {
    %c0_i32 = arith.constant 0 : i32
    %c0_i32_0 = arith.constant 0 : i32
    %c0_i32_1 = arith.constant 0 : i32
    return %c0_i32, %c0_i32_0 : i32, i32
  }
  func.func @transform_3(%arg0: i32, %arg1: i32) -> (i32, i32) {
    %c0_i32 = arith.constant 0 : i32
    %c0_i32_0 = arith.constant 0 : i32
    %c0_i32_1 = arith.constant 0 : i32
    return %c0_i32, %c0_i32_0 : i32, i32
  }
  func.func @transform_4(%arg0: i32, %arg1: i32) -> (i32, i32, i32, i32, i32) {
    %c0_i32 = arith.constant 0 : i32
    %c0_i32_0 = arith.constant 0 : i32
    %c0_i32_1 = arith.constant 0 : i32
    %c0_i32_2 = arith.constant 0 : i32
    return %arg0, %arg1, %c0_i32, %c0_i32_0, %c0_i32_1 : i32, i32, i32, i32, i32
  }
}

</mosaic_0001>

<bundles_post_ra>
// kernel: tpu_custom_call.1
= control target key start
LH: loop header
LB: loop body
LE: loop exit
PB: predicated region body
PF: predicated region fallthrough
CT: control target
= control target key end

     0   :  { %9 = vsyncpa [#allocation3], 0  ;;  %s1856_s0 = inlined_call_operand.vmem [shape: f32[2,16,16,4], index: 0, kind: input, shape index: {}]   ;;  %s1857_s1 = inlined_call_operand.vmem [shape: f32[2,16,16,4], index: 1, kind: input, shape index: {}]   ;;  %s1858_s2 = inlined_call_operand.vmem [shape: f32[16,32], index: 2, kind: input, shape index: {}]   ;;  %s1859_s3 = inlined_call_operand.vmem [shape: f32[1,32], index: 3, kind: input, shape index: {}]   ;;  %s1860_s4 = inlined_call_operand.hbm [shape: f32[2,16,2,16,16], index: 4, kind: output, shape index: {}]  }
   0x1   :  { %11 = vsyncpa [#allocation3 + $0x1], 0  ;;  %s1340_s15 = smov 0   ;;  %s1342_s16 = smov 0  }
   0x2   :  { %s1344_s17 = smov 0   ;;  %s1346_s18 = smov 0  }
   0x3   :  { %s1348_s19 = smov 0   ;;  %s1350_s20 = smov 0  }
   0x4   :  { %s1352_s21 = smov 0   ;;  %s1354_s22 = smov 0  }
   0x5 LB: > { %s1023_s23 = sadd.s32 4294967295, %s1307_s22   ;;  %s1024_s24 = sadd.s32 4294967294, %s1307_s22   ;;  %s1307_s22 = sphi %s1354_s22, %s17_s22   ;;  %s1303_s21 = sphi %s1352_s21, %s1873_s21   ;;  %s1299_s20 = sphi %s1350_s20, %s1872_s20   ;;  %s1295_s19 = sphi %s1348_s19, %s1871_s19   ;;  %s1291_s18 = sphi %s1346_s18, %s1870_s18   ;;  %s1287_s17 = sphi %s1344_s17, %s1869_s17   ;;  %s1283_s16 = sphi %s1342_s16, %s1868_s16   ;;  %s1279_s15 = sphi %s1340_s15, %s1867_s15  }
   0x6   : > { %s26_s25 = sadd.s32 1, %s1299_s20  ;;  %s29_s26 = sadd.s32 1, %s1303_s21 }
   0x7   : > { %p27_p0 = scmp.ge.s32.totalorder %s26_s25, 2  ;;  %p154_p1 = scmp.ne.s32.totalorder %s1287_s17, %s1283_s16 }
   0x8   : > { %p155_p2 = scmp.eq.s32.totalorder %s1023_s23, 3  ;;  %p160_p5 = scmp.ne.s32.totalorder %s1283_s16, %s1279_s15 }
   0x9   : > { %s1875_s25 = smov (%p27_p0, %s26_s25), 0  ;;  %s1877_s26 = smov (!%p27_p0, %s29_s26), %s1303_s21 }
   0xa   : > { %s140_s27 = ssub.s32 %s1299_s20, %s1875_s25  ;;  %p1391_p3 = por %p155_p2, %p154_p1 }
   0xb   : > { %p31_p4 = scmp.ge.s32.totalorder %s1877_s26, 2  ;;  %p161_p6 = scmp.eq.s32.totalorder %s1024_s24, 3 }
   0xc   : > { %p1029_p7 = scmp.ge.s32.totalorder %s1307_s22, 1  ;;  %p219_p9 = scmp.lt.s32.totalorder %s1307_s22, 5 }
   0xd   : > { %s1879_s26 = smov (%p31_p4, %s1877_s26), 0  ;;  %p1400_p8 = por %p161_p6, %p160_p5 }
   0xe   : > { %s139_s30 = ssub.s32 %s1303_s21, %s1879_s26  ;;  %s144_s5 = sadd.s32 1, %s1287_s17 }
   0xf   : > { %s141_s6 = sor.u32 %s140_s27, %s139_s30  ;;  %p220_p10 = pnand %p1029_p7, %p219_p9 }
  0x10   : > { %p142_p11 = scmp.eq.s32.totalorder %s141_s6, 0  ;;  %s1031_s8 = sshll.u32 (!%p220_p10), %s1291_s18, 3 }
  0x11   : > { %223 = sbr.rel (%p220_p10) target bundleno = 571 (0x23b), region = 36  ;;  %p264_p12 = scmp.lt.s32.totalorder (!%p220_p10), %s1295_s19, 1 }
  0x12   : > { %s1409_s7 = scalar_select %p142_p11, %s1287_s17, %s144_s5  }
  0x13   : > { %p266_p13 = scmp.lt.s32.totalorder (!%p220_p10), %s1031_s8, 15  ;;  %s1087_s14 = sadd.s32 (!%p220_p10), 8, %s1031_s8 }
  0x14   : > { %p1419_p0 = scmp.lt.s32.totalorder (!%p220_p10), %s1087_s14, 15  ;;  %s1861_s6 = smov (!%p220_p10), 8  }
  0x15   : > { %p308_p1 = scmp.ne.s32.totalorder (!%p220_p10), %s1291_s18, 1  ;;  %s1312_s24 = smov (!%p220_p10), 112  }
  0x16   : > { %s1414_s9 = scalar_select %p264_p12, %s1295_s19, 1  ;;  %vm332_vm0 = vcmask 1046528   ;;  %v585_v14 = vld [vmem:[%s1858_s2 + $0x8] sm:$0xff]  ;;  %v584_v15 = vld [vmem:[%s1858_s2] sm:$0xff]  ;;  %vm533_vm1 = vcmask 31744   ;;  %vm550_vm2 = vcmask 64512  }
  0x17   : > { %s267_s10 = scalar_select %p266_p13, %s1031_s8, 15  ;;  %1107 = vmatprep.subr.mxu0 %v585_v14  ;;  %1135 = vmatprep.subr.mxu1 %v585_v14  ;;  %vm567_vm3 = vcmask 97280   ;;  %vm593_vm4 = vcmask 130048  }
  0x18   : > { %s1033_s11 = sshll.u32 %s1414_s9, 5  ;;  %s1881_s14 = smov (!%p1419_p0, %s1087_s14), 15  ;;  %1108 = vmatpush3.msra.mxu0 %v585_v14  ;;  %1137 = vmatpush3.msra.mxu1 %v585_v14 }
  0x19   : > { %s1032_s12 = sshll.u32 %s267_s10, 1  ;;  %s1883_s14 = smov (!%p1419_p0, %s1881_s14), 15  ;;  %1109 = vmatprep.subr.mxu0 %v584_v15  ;;  %1136 = vmatprep.subr.mxu1 %v584_v15 }
  0x1a   : > { %s270_s13 = sadd.s32 %s1033_s11, %s1032_s12  ;;  %s1039_s8 = sshll.u32 %s1883_s14, 1  ;;  %1110 = vmatpush3.msra.mxu0 %v584_v15  ;;  %1138 = vmatpush3.msra.mxu1 %v584_v15 }
  0x1b   : > { %s1034_s23 = sshll.u32 %s270_s13, 3  ;;  %s284_s10 = sadd.s32 %s1039_s8, %s1033_s11 }
  0x1c   : > { %s1426_s5 = scalar_lea.vmem %s1856_s0, %s1034_s23  ;;  %s1041_s23 = sshll.u32 %s284_s10, 3 }
  0x1d   : > { %v1429_v0 = vld [vmem:[%s1426_s5 + $0x50] sm:$0xff]  ;;  %v1441_v2 = vld [vmem:[%s1426_s5 + $0x8] sm:$0xff]  ;;  %v1444_v3 = vld [vmem:[%s1426_s5 + $0x58] sm:$0xff]  ;;  %s1310_s9 = smov 4   ;;  %s1866_s10 = smov 8  }
  0x1e   : > { %v1432_v1 = vld [vmem:[%s1426_s5 + $0x10] sm:$0xff]  ;;  %452 = vrot.lane.b32.xlu1 %v1429_v0, %s1861_s6  ;;  %v1447_v4 = vld [vmem:[%s1426_s5 + $0x18] sm:$0xff]  ;;  %v334_v5 = vrot.slane %v1441_v2, 1  ;;  %v1451_v6 = vld [vmem:[%s1426_s5] sm:$0xff]  ;;  %v348_v16 = vrot.slane %v1429_v0, 1  ;;  %v349_v18 = vrot.slane %v1444_v3, 1 }
  0x1f   : > { %436 = vrot.lane.b32.xlu0 %v1432_v1, %s1861_s6  ;;  %v333_v7 = vrot.slane %v1451_v6, 1  ;;  %v1457_v8 = vld [vmem:[%s1426_s5 + $0x48] sm:$0xff]  ;;  %v1460_v9 = vld [vmem:[%s1426_s5 + $0x40] sm:$0xff]  ;;  %v336_v17 = vrot.slane %v1432_v1, 1  ;;  %s309_s11 = scalar_select %p308_p1, 1, 0 }
  0x20   : > { %v365_v10 = vsel %vm332_vm0, %v334_v5, 0.0  ;;  %v346_v12 = vrot.slane %v1457_v8, 1  ;;  %v345_v13 = vrot.slane %v1460_v9, 1  ;;  %v337_v19 = vrot.slane %v1447_v4, 1  ;;  %v1521_v35 = vld [vmem:[%s1426_s5 + $0x60] sm:$0xff]  ;;  %v1527_v37 = vld [vmem:[%s1426_s5 + $0x68] sm:$0xff] }
  0x21   : > { %v335_v11 = vsel %vm332_vm0, %v333_v7, %v334_v5  ;;  %s310_s8 = scvt.s32.f32 %s309_s11  ;;  %v350_v25 = vsel %vm332_vm0, %v348_v16, %v349_v18  ;;  %v370_v31 = vsel %vm332_vm0, %v349_v18, 0.0  ;;  %v1524_v36 = vld [vmem:[%s1426_s5 + $0x20] sm:$0xff]  ;;  %v1530_v38 = vld [vmem:[%s1426_s5 + $0x28] sm:$0xff]  ;;  %v351_v39 = vrot.slane %v1521_v35, 1  ;;  %v1557_v47 = vld [vmem:[%s1426_s5 + $0x70] sm:$0xff]  ;;  %s1088_s27 = sshll.u32 %s1291_s18, 5 }
  0x22   : > { %454 = vrot.lane.b32.xlu1 %v1444_v3, %s1861_s6  ;;  %v1491_v20 = vsel %vm332_vm0, %v346_v12, 0.0  ;;  %v1494_v21 = vsel %vm332_vm0, %v345_v13, %v346_v12  ;;  %v338_v26 = vsel %vm332_vm0, %v336_v17, %v337_v19  ;;  %v366_v32 = vsel %vm332_vm0, %v337_v19, 0.0  ;;  %v1560_v48 = vld [vmem:[%s1426_s5 + $0x30] sm:$0xff]  ;;  %v1563_v49 = vld [vmem:[%s1426_s5 + $0x78] sm:$0xff]  ;;  %s1078_s30 = sshll.u32 %s1295_s19, 6 }
  0x23   : > { %438 = vrot.lane.b32.xlu0 %v1447_v4, %s1861_s6  ;;  %s286_s6 = scalar_lea.vmem %s1857_s1, %s1041_s23  ;;  %v313_v24 = vstv %s310_s8  ;;  %v339_v40 = vrot.slane %v1524_v36, 1  ;;  %v352_v41 = vrot.slane %v1527_v37, 1  ;;  %v340_v42 = vrot.slane %v1530_v38, 1  ;;  %v1566_v50 = vld [vmem:[%s1426_s5 + $0x38] sm:$0xff]  ;;  %s260_s5 = sand.u32 1, %s1283_s16  }
  0x24   : > { %v311_v22 = vld [vmem:[%s286_s6] sm:$0xff]  ;;  %v312_v23 = vld [vmem:[%s286_s6 + $0x8] sm:$0xff]  ;;  %s1311_s6 = smov 12   ;;  %v354_v51 = vrot.slane %v1557_v47, 1  ;;  %v342_v52 = vrot.slane %v1560_v48, 1  ;;  %v355_v53 = vrot.slane %v1563_v49, 1 }
  0x25   : > { %v1502_v27 = vmul.f32 %v313_v24, %v311_v22  ;;  %v1504_v28 = vmul.f32 %v313_v24, %v312_v23  ;;  %v353_v43 = vsel %vm332_vm0, %v351_v39, %v352_v41  ;;  %v341_v44 = vsel %vm332_vm0, %v339_v40, %v340_v42  ;;  %s1030_s23 = sshll.u32 %s260_s5, 8  ;;  %s1804_s18 = scalar_lea.sflag [#allocation3], %s260_s5 }
  0x26   : > { %390 = vrot.lane.b32.xlu1 %v365_v10, %s1310_s9  ;;  %v371_v45 = vsel %vm332_vm0, %v352_v41, 0.0  ;;  %v367_v46 = vsel %vm332_vm0, %v340_v42, 0.0  ;;  %v343_v54 = vrot.slane %v1566_v50, 1  ;;  %v356_v55 = vsel %vm332_vm0, %v354_v51, %v355_v53  ;;  %s1698_s14 = scalar_lea.vmem [#allocation2], %s1030_s23  ;;  %s1313_s23 = smov [#allocation2]  }
  0x27   : > { %388 = vrot.lane.b32.xlu0 %v335_v11, %s1310_s9  ;;  %v375_v29 = vrot.slane %v1502_v27, 1  ;;  %v376_v30 = vrot.slane %v1504_v28, 1  ;;  %v372_v57 = vsel %vm332_vm0, %v355_v53, 0.0  ;;  %s917_s8 = sshll.u32 %s1698_s14, 4  ;;  %s1798_s8 = int_to_ptr.vmem [resolvable:$true] %s917_s8 }
  0x28   : > { %v344_v56 = vsel %vm332_vm0, %v342_v52, %v343_v54  ;;  %v368_v58 = vsel %vm332_vm0, %v343_v54, 0.0  ;;  %s1215_s19 = scalar_lea.vmem %s1798_s8, 4096 }
  0x29   : > { %v377_v33 = vsel %vm332_vm0, %v375_v29, %v376_v30  ;;  %v379_v34 = vsel %vm332_vm0, %v376_v30, 0.0  ;;  %p1216_p2 = scmp.ne.s32.totalorder %s1798_s8, %s1215_s19 }
  0x2a   : > { %406 = vrot.lane.b32.xlu1 %v1491_v20, %s1310_s9 }
  0x2b   : > { %404 = vrot.lane.b32.xlu0 %v1494_v21, %s1310_s9  ;;  %p1217_p4 = pnand %p1216_p2, %p1391_p3 }
  0x2d   : > { %p1218_p5 = pneg %p1217_p4 }
  0x2e   : > { %501 = vrot.lane.b32.xlu1 %v350_v25, %s1311_s6 }
  0x2f   : > { %485 = vrot.lane.b32.xlu0 %v338_v26, %s1311_s6 }
  0x32   : > { %503 = vrot.lane.b32.xlu1 %v370_v31, %s1311_s6 }
  0x33   : > { %487 = vrot.lane.b32.xlu0 %v366_v32, %s1311_s6 }
  0x36   : > { %408 = vrot.lane.b32.xlu1 %v350_v25, %s1310_s9 }
  0x37   : > { %392 = vrot.lane.b32.xlu0 %v338_v26, %s1310_s9 }
  0x3a   : > { %410 = vrot.lane.b32.xlu1 %v370_v31, %s1310_s9 }
  0x3b   : > { %394 = vrot.lane.b32.xlu0 %v366_v32, %s1310_s9 }
  0x3e   : > { %456 = vrot.lane.b32.xlu1 %v1521_v35, %s1866_s10 }
  0x3f   : > { %440 = vrot.lane.b32.xlu0 %v1524_v36, %s1866_s10 }
  0x42   : > { %458 = vrot.lane.b32.xlu1 %v1527_v37, %s1866_s10 }
  0x43   : > { %442 = vrot.lane.b32.xlu0 %v1530_v38, %s1866_s10 }
  0x46   : > { %505 = vrot.lane.b32.xlu1 %v353_v43, %s1311_s6 }
  0x47   : > { %489 = vrot.lane.b32.xlu0 %v341_v44, %s1311_s6 }
  0x4a   : > { %507 = vrot.lane.b32.xlu1 %v371_v45, %s1311_s6 }
  0x4b   : > { %491 = vrot.lane.b32.xlu0 %v367_v46, %s1311_s6 }
  0x4e   : > { %412 = vrot.lane.b32.xlu1 %v353_v43, %s1310_s9 }
  0x4f   : > { %396 = vrot.lane.b32.xlu0 %v341_v44, %s1310_s9 }
  0x52   : > { %414 = vrot.lane.b32.xlu1 %v371_v45, %s1310_s9 }
  0x53   : > { %398 = vrot.lane.b32.xlu0 %v367_v46, %s1310_s9 }
  0x56   : > { %460 = vrot.lane.b32.xlu1 %v1557_v47, %s1866_s10 }
  0x57   : > { %444 = vrot.lane.b32.xlu0 %v1560_v48, %s1866_s10 }
  0x5a   : > { %462 = vrot.lane.b32.xlu1 %v1563_v49, %s1866_s10 }
  0x5b   : > { %446 = vrot.lane.b32.xlu0 %v1566_v50, %s1866_s10 }
  0x5e   : > { %509 = vrot.lane.b32.xlu1 %v356_v55, %s1311_s6 }
  0x5f   : > { %493 = vrot.lane.b32.xlu0 %v344_v56, %s1311_s6 }
  0x62   : > { %511 = vrot.lane.b32.xlu1 %v372_v57, %s1311_s6 }
  0x63   : > { %495 = vrot.lane.b32.xlu0 %v368_v58, %s1311_s6 }
  0x66   : > { %416 = vrot.lane.b32.xlu1 %v356_v55, %s1310_s9 }
  0x67   : > { %400 = vrot.lane.b32.xlu0 %v344_v56, %s1310_s9 }
  0x6a   : > { %418 = vrot.lane.b32.xlu1 %v372_v57, %s1310_s9 }
  0x6b   : > { %402 = vrot.lane.b32.xlu0 %v368_v58, %s1310_s9  ;;  %s914_s9 = sadd.s32 %s1088_s27, %s1078_s30 }
  0x6c   : > { %s1079_s11 = sshll.u32 %s914_s9, 7 }
  0x6d   : > { %s1794_s13 = scalar_lea.hbm %s1860_s4, %s1079_s11 }
  0x6e   : > { %464 = vrot.lane.b32.xlu1 %v1502_v27, %s1866_s10 }
  0x6f   : > { %448 = vrot.lane.b32.xlu0 %v1460_v9, %s1866_s10 }
  0x72   : > { %466 = vrot.lane.b32.xlu1 %v1504_v28, %s1866_s10 }
  0x73   : > { %450 = vrot.lane.b32.xlu0 %v1457_v8, %s1866_s10 }
  0x76   : > { %513 = vrot.lane.b32.xlu1 %v377_v33, %s1311_s6 }
  0x77   : > { %497 = vrot.lane.b32.xlu0 %v1494_v21, %s1311_s6 }
  0x7a   : > { %515 = vrot.lane.b32.xlu1 %v379_v34, %s1311_s6 }
  0x7b   : > { %499 = vrot.lane.b32.xlu0 %v1491_v20, %s1311_s6 }
  0x90   : > { %v453_v59 = vpop.permute.xlu1 %452 }
  0x91   : > { %v437_v60 = vpop.permute.xlu0 %436 }
  0x94   : > { %v455_v61 = vpop.permute.xlu1 %454 }
  0x95   : > { %v439_v62 = vpop.permute.xlu0 %438 }
  0x98   : > { %v391_v63 = vpop.permute.xlu1 %390 }
  0x99   : > { %v389_v5 = vpop.permute.xlu0 %388  ;;  %v535_v17 = vsel %vm533_vm1, %v1441_v2, %v391_v63 }
  0x9a   : > { %v534_v11 = vsel %vm533_vm1, %v1451_v6, %v389_v5  ;;  %v552_v21 = vsel %vm550_vm2, %v535_v17, %v439_v62 }
  0x9b   : > { %v551_v15 = vsel %vm550_vm2, %v534_v11, %v437_v60 }
  0x9c   : > { %v407_v7 = vpop.permute.xlu1 %406 }
  0x9d   : > { %v405_v10 = vpop.permute.xlu0 %404  ;;  %v543_v18 = vsel %vm533_vm1, %v1457_v8, %v407_v7 }
  0x9e   : > { %v542_v12 = vsel %vm533_vm1, %v1460_v9, %v405_v10  ;;  %v560_v9 = vsel %vm550_vm2, %v543_v18, %v455_v61 }
  0x9f   : > { %v559_v16 = vsel %vm550_vm2, %v542_v12, %v453_v59 }
  0xa0   : > { %v502_v13 = vpop.permute.xlu1 %501 }
  0xa1   : > { %v486_v14 = vpop.permute.xlu0 %485  ;;  %v576_v19 = vsel %vm567_vm3, %v559_v16, %v502_v13 }
  0xa2   : > { %v568_v6 = vsel %vm567_vm3, %v551_v15, %v486_v14  ;;  %1123 = vmatprep.mubr.msk.f32.mxu1 %vm593_vm4, %v576_v19 }
  0xa3   : > { %1111 = vmatprep.mubr.msk.f32.mxu0 %vm593_vm4, %v568_v6 }
  0xa4   : > { %v504_v20 = vpop.permute.xlu1 %503 }
  0xa5   : > { %v488_v22 = vpop.permute.xlu0 %487  ;;  %v577_v23 = vsel %vm567_vm3, %v560_v9, %v504_v20 }
  0xa6   : > { %v569_v2 = vsel %vm567_vm3, %v552_v21, %v488_v22  ;;  %1124 = vmatmul.mubr.msk.f32.vlgmr.msra.gmra.mxu1 %vm593_vm4, %v577_v23 }
  0xa7   : > { %1112 = vmatmul.mubr.msk.f32.vlgmr.msra.gmra.mxu0 %vm593_vm4, %v569_v2 }
  0xa8   : > { %v409_v8 = vpop.permute.xlu1 %408 }
  0xa9   : > { %v393_v24 = vpop.permute.xlu0 %392  ;;  %v544_v31 = vsel %vm533_vm1, %v1429_v0, %v409_v8 }
  0xaa   : > { %v536_v32 = vsel %vm533_vm1, %v1432_v1, %v393_v24 }
  0xac   : > { %v411_v25 = vpop.permute.xlu1 %410 }
  0xad   : > { %v395_v26 = vpop.permute.xlu0 %394  ;;  %v545_v0 = vsel %vm533_vm1, %v1444_v3, %v411_v25 }
  0xae   : > { %v537_v1 = vsel %vm533_vm1, %v1447_v4, %v395_v26 }
  0xb0   : > { %v457_v27 = vpop.permute.xlu1 %456 }
  0xb1   : > { %v441_v28 = vpop.permute.xlu0 %440  ;;  %v561_v33 = vsel %vm550_vm2, %v544_v31, %v457_v27 }
  0xb2   : > { %v553_v34 = vsel %vm550_vm2, %v536_v32, %v441_v28 }
  0xb4   : > { %v459_v29 = vpop.permute.xlu1 %458 }
  0xb5   : > { %v443_v30 = vpop.permute.xlu0 %442  ;;  %v562_v43 = vsel %vm550_vm2, %v545_v0, %v459_v29 }
  0xb6   : > { %v554_v44 = vsel %vm550_vm2, %v537_v1, %v443_v30 }
  0xb8   : > { %v506_v39 = vpop.permute.xlu1 %505 }
  0xb9   : > { %v490_v40 = vpop.permute.xlu0 %489  ;;  %v578_v41 = vsel %vm567_vm3, %v561_v33, %v506_v39 }
  0xba   : > { %v570_v42 = vsel %vm567_vm3, %v553_v34, %v490_v40  ;;  %1126 = vmatprep.mubr.msk.f32.mxu1 %vm593_vm4, %v578_v41 }
  0xbb   : > { %1114 = vmatprep.mubr.msk.f32.mxu0 %vm593_vm4, %v570_v42 }
  0xbc   : > { %v508_v45 = vpop.permute.xlu1 %507 }
  0xbd   : > { %v492_v46 = vpop.permute.xlu0 %491  ;;  %v579_v51 = vsel %vm567_vm3, %v562_v43, %v508_v45 }
  0xbe   : > { %v571_v52 = vsel %vm567_vm3, %v554_v44, %v492_v46  ;;  %1127 = vmatmul.mubr.msk.f32.gmra.mxu1 %vm593_vm4, %v579_v51 }
  0xbf   : > { %1115 = vmatmul.mubr.msk.f32.gmra.mxu0 %vm593_vm4, %v571_v52 }
  0xc0   : > { %v413_v53 = vpop.permute.xlu1 %412 }
  0xc1   : > { %v397_v54 = vpop.permute.xlu0 %396  ;;  %v546_v59 = vsel %vm533_vm1, %v1521_v35, %v413_v53 }
  0xc2   : > { %v538_v60 = vsel %vm533_vm1, %v1524_v36, %v397_v54 }
  0xc4   : > { %v415_v3 = vpop.permute.xlu1 %414 }
  0xc5   : > { %v399_v55 = vpop.permute.xlu0 %398  ;;  %v547_v35 = vsel %vm533_vm1, %v1527_v37, %v415_v3 }
  0xc6   : > { %v539_v36 = vsel %vm533_vm1, %v1530_v38, %v399_v55 }
  0xc8   : > { %v461_v56 = vpop.permute.xlu1 %460 }
  0xc9   : > { %v445_v4 = vpop.permute.xlu0 %444  ;;  %v563_v61 = vsel %vm550_vm2, %v546_v59, %v461_v56 }
  0xca   : > { %v555_v62 = vsel %vm550_vm2, %v538_v60, %v445_v4 }
  0xcc   : > { %v463_v57 = vpop.permute.xlu1 %462 }
  0xcd   : > { %v447_v58 = vpop.permute.xlu0 %446  ;;  %v564_v11 = vsel %vm550_vm2, %v547_v35, %v463_v57 }
  0xce   : > { %v556_v12 = vsel %vm550_vm2, %v539_v36, %v447_v58 }
  0xd0   : > { %v510_v63 = vpop.permute.xlu1 %509 }
  0xd1   : > { %v494_v5 = vpop.permute.xlu0 %493  ;;  %v580_v7 = vsel %vm567_vm3, %v563_v61, %v510_v63 }
  0xd2   : > { %v572_v10 = vsel %vm567_vm3, %v555_v62, %v494_v5  ;;  %1129 = vmatprep.mubr.msk.f32.mxu1 %vm593_vm4, %v580_v7 }
  0xd3   : > { %1117 = vmatprep.mubr.msk.f32.mxu0 %vm593_vm4, %v572_v10 }
  0xd4   : > { %v512_v13 = vpop.permute.xlu1 %511 }
  0xd5   : > { %v496_v14 = vpop.permute.xlu0 %495  ;;  %v581_v15 = vsel %vm567_vm3, %v564_v11, %v512_v13 }
  0xd6   : > { %v573_v16 = vsel %vm567_vm3, %v556_v12, %v496_v14  ;;  %1130 = vmatmul.mubr.msk.f32.gmra.mxu1 %vm593_vm4, %v581_v15 }
  0xd7   : > { %1118 = vmatmul.mubr.msk.f32.gmra.mxu0 %vm593_vm4, %v573_v16 }
  0xd8   : > { %v417_v17 = vpop.permute.xlu1 %416 }
  0xd9   : > { %v401_v18 = vpop.permute.xlu0 %400  ;;  %v548_v21 = vsel %vm533_vm1, %v1557_v47, %v417_v17 }
  0xda   : > { %v540_v22 = vsel %vm533_vm1, %v1560_v48, %v401_v18 }
  0xdc   : > { %v419_v37 = vpop.permute.xlu1 %418 }
  0xdd   : > { %v403_v6 = vpop.permute.xlu0 %402  ;;  %v549_v47 = vsel %vm533_vm1, %v1563_v49, %v419_v37  ;;  %v1690_v49 = vld [vmem:[%s1859_s3] ss:$0 sm:$0xff] }
  0xde   : > { %v541_v48 = vsel %vm533_vm1, %v1566_v50, %v403_v6 }
  0xe0   : > { %v465_v19 = vpop.permute.xlu1 %464 }
  0xe1   : > { %v449_v38 = vpop.permute.xlu0 %448  ;;  %v565_v23 = vsel %vm550_vm2, %v548_v21, %v465_v19 }
  0xe2   : > { %v557_v2 = vsel %vm550_vm2, %v540_v22, %v449_v38 }
  0xe4   : > { %v467_v9 = vpop.permute.xlu1 %466 }
  0xe5   : > { %v451_v20 = vpop.permute.xlu0 %450  ;;  %v566_v27 = vsel %vm550_vm2, %v549_v47, %v467_v9 }
  0xe6   : > { %v558_v28 = vsel %vm550_vm2, %v541_v48, %v451_v20 }
  0xe8   : > { %v514_v8 = vpop.permute.xlu1 %513 }
  0xe9   : > { %v498_v24 = vpop.permute.xlu0 %497  ;;  %v582_v25 = vsel %vm567_vm3, %v565_v23, %v514_v8 }
  0xea   : > { %v574_v26 = vsel %vm567_vm3, %v557_v2, %v498_v24  ;;  %1132 = vmatprep.mubr.msk.f32.mxu1 %vm593_vm4, %v582_v25 }
  0xeb   : > { %1120 = vmatprep.mubr.msk.f32.mxu0 %vm593_vm4, %v574_v26 }
  0xec   : > { %v516_v29 = vpop.permute.xlu1 %515 }
  0xed   : > { %v500_v30 = vpop.permute.xlu0 %499  ;;  %v583_v31 = vsel %vm567_vm3, %v566_v27, %v516_v29 }
  0xee   : > { %v575_v32 = vsel %vm567_vm3, %v558_v28, %v500_v30  ;;  %1133 = vmatmul.mubr.msk.f32.gmra.mxu1 %vm593_vm4, %v583_v31 }
  0xef   : > { %1121 = vmatmul.mubr.msk.f32.gmra.mxu0 %vm593_vm4, %v575_v32 }
 0x166   : > { %v1125_v33 = vpop.f32.mrf.mxu1 }
 0x167   : > { %v1113_v50 = vpop.f32.mrf.mxu0  ;;  %v754_v39 = vadd.f32 %v1125_v33, %v1690_v49 }
 0x168   : > { %v714_v34 = vadd.f32 %v1113_v50, %v1690_v49  ;;  %v748_v41 = vpop.f32.mrf.mxu1 }
 0x169   : > { %v708_v40 = vpop.f32.mrf.mxu0  ;;  %v796_v0 = vmax.f32 %v754_v39, 0.0  ;;  %v749_v43 = vadd.f32 %v1690_v49, %v748_v41 }
 0x16a   : > { %v788_v42 = vmax.f32 %v714_v34, 0.0  ;;  %v709_v1 = vadd.f32 %v1690_v49, %v708_v40 }
 0x16b   : > { %812 = vst.msk [vmem:[%s1698_s14 + $0x88] sm:$0xff] %vm593_vm4, %v796_v0  ;;  %v795_v45 = vmax.f32 %v749_v43, 0.0 }
 0x16c   : > { %804 = vst.msk [vmem:[%s1698_s14 + $0x8] sm:$0xff] %vm593_vm4, %v788_v42  ;;  %v787_v44 = vmax.f32 %v709_v1, 0.0  ;;  %837 = vrot.lane.b32.xlu1 %v788_v42, %s1312_s24 }
 0x16d   : > { %811 = vst.msk [vmem:[%s1698_s14 + $0x80] sm:$0xff] %vm593_vm4, %v795_v45 }
 0x16e   : > { %803 = vst.msk [vmem:[%s1698_s14] sm:$0xff] %vm593_vm4, %v787_v44  ;;  %835 = vrot.lane.b32.xlu0 %v787_v44, %s1312_s24 }
 0x170   : > { %853 = vrot.lane.b32.xlu1 %v796_v0, %s1312_s24 }
 0x172   : > { %851 = vrot.lane.b32.xlu0 %v795_v45, %s1312_s24 }
 0x17e   : > { %v1128_v51 = vpop.f32.mrf.mxu1 }
 0x17f   : > { %v1116_v46 = vpop.f32.mrf.mxu0  ;;  %v764_v53 = vadd.f32 %v1128_v51, %v1690_v49 }
 0x180   : > { %v724_v52 = vadd.f32 %v1116_v46, %v1690_v49  ;;  %v758_v3 = vpop.f32.mrf.mxu1 }
 0x181   : > { %v718_v54 = vpop.f32.mrf.mxu0  ;;  %v798_v56 = vmax.f32 %v764_v53, 0.0  ;;  %v759_v57 = vadd.f32 %v1690_v49, %v758_v3 }
 0x182   : > { %v790_v55 = vmax.f32 %v724_v52, 0.0  ;;  %v719_v4 = vadd.f32 %v1690_v49, %v718_v54 }
 0x183   : > { %814 = vst.msk [vmem:[%s1698_s14 + $0xa8] sm:$0xff] %vm593_vm4, %v798_v56  ;;  %v797_v59 = vmax.f32 %v759_v57, 0.0 }
 0x184   : > { %806 = vst.msk [vmem:[%s1698_s14 + $0x28] sm:$0xff] %vm593_vm4, %v790_v55  ;;  %v789_v58 = vmax.f32 %v719_v4, 0.0  ;;  %841 = vrot.lane.b32.xlu1 %v790_v55, %s1312_s24 }
 0x185   : > { %813 = vst.msk [vmem:[%s1698_s14 + $0xa0] sm:$0xff] %vm593_vm4, %v797_v59 }
 0x186   : > { %805 = vst.msk [vmem:[%s1698_s14 + $0x20] sm:$0xff] %vm593_vm4, %v789_v58  ;;  %839 = vrot.lane.b32.xlu0 %v789_v58, %s1312_s24 }
 0x188   : > { %857 = vrot.lane.b32.xlu1 %v798_v56, %s1312_s24 }
 0x18a   : > { %855 = vrot.lane.b32.xlu0 %v797_v59, %s1312_s24 }
 0x196   : > { %v1131_v61 = vpop.f32.mrf.mxu1 }
 0x197   : > { %v1119_v60 = vpop.f32.mrf.mxu0  ;;  %v774_v63 = vadd.f32 %v1131_v61, %v1690_v49 }
 0x198   : > { %v734_v62 = vadd.f32 %v1119_v60, %v1690_v49  ;;  %v768_v7 = vpop.f32.mrf.mxu1 }
 0x199   : > { %v728_v5 = vpop.f32.mrf.mxu0  ;;  %v800_v35 = vmax.f32 %v774_v63, 0.0  ;;  %v769_v11 = vadd.f32 %v1690_v49, %v768_v7 }
 0x19a   : > { %v792_v10 = vmax.f32 %v734_v62, 0.0  ;;  %v729_v36 = vadd.f32 %v1690_v49, %v728_v5 }
 0x19b   : > { %816 = vst.msk [vmem:[%s1698_s14 + $0xc8] sm:$0xff] %vm593_vm4, %v800_v35  ;;  %v799_v13 = vmax.f32 %v769_v11, 0.0 }
 0x19c   : > { %808 = vst.msk [vmem:[%s1698_s14 + $0x48] sm:$0xff] %vm593_vm4, %v792_v10  ;;  %v791_v12 = vmax.f32 %v729_v36, 0.0  ;;  %845 = vrot.lane.b32.xlu1 %v792_v10, %s1312_s24 }
 0x19d   : > { %815 = vst.msk [vmem:[%s1698_s14 + $0xc0] sm:$0xff] %vm593_vm4, %v799_v13 }
 0x19e   : > { %807 = vst.msk [vmem:[%s1698_s14 + $0x40] sm:$0xff] %vm593_vm4, %v791_v12  ;;  %843 = vrot.lane.b32.xlu0 %v791_v12, %s1312_s24 }
 0x1a0   : > { %861 = vrot.lane.b32.xlu1 %v800_v35, %s1312_s24 }
 0x1a2   : > { %859 = vrot.lane.b32.xlu0 %v799_v13, %s1312_s24 }
 0x1ae   : > { %v1134_v15 = vpop.f32.mrf.mxu1 }
 0x1af   : > { %v1122_v14 = vpop.f32.mrf.mxu0  ;;  %v784_v17 = vadd.f32 %v1134_v15, %v1690_v49 }
 0x1b0   : > { %v744_v16 = vadd.f32 %v1122_v14, %v1690_v49  ;;  %v778_v37 = vpop.f32.mrf.mxu1 }
 0x1b1   : > { %v738_v18 = vpop.f32.mrf.mxu0  ;;  %v802_v19 = vmax.f32 %v784_v17, 0.0  ;;  %v779_v9 = vadd.f32 %v1690_v49, %v778_v37 }
 0x1b2   : > { %v794_v6 = vmax.f32 %v744_v16, 0.0  ;;  %v739_v38 = vadd.f32 %v1690_v49, %v738_v18 }
 0x1b3   : > { %818 = vst.msk [vmem:[%s1698_s14 + $0xe8] sm:$0xff] %vm593_vm4, %v802_v19  ;;  %v801_v21 = vmax.f32 %v779_v9, 0.0 }
 0x1b4   : > { %810 = vst.msk [vmem:[%s1698_s14 + $0x68] sm:$0xff] %vm593_vm4, %v794_v6  ;;  %v793_v20 = vmax.f32 %v739_v38, 0.0  ;;  %849 = vrot.lane.b32.xlu1 %v794_v6, %s1312_s24 }
 0x1b5   : > { %817 = vst.msk [vmem:[%s1698_s14 + $0xe0] sm:$0xff] %vm593_vm4, %v801_v21 }
 0x1b6   : > { %809 = vst.msk [vmem:[%s1698_s14 + $0x60] sm:$0xff] %vm593_vm4, %v793_v20  ;;  %847 = vrot.lane.b32.xlu0 %v793_v20, %s1312_s24 }
 0x1b8   : > { %865 = vrot.lane.b32.xlu1 %v802_v19, %s1312_s24 }
 0x1ba   : > { %863 = vrot.lane.b32.xlu0 %v801_v21, %s1312_s24  ;;  %s1219_s24 = sshll.u32 %s1313_s23, 4  ;;  %s1220_s24 = int_to_ptr.vmem [resolvable:$false] %s1219_s24 }
 0x1bb   : > { %s1221_s27 = scalar_lea.vmem %s1220_s24, 8192  ;;  %p1222_p6 = scmp.lt.s32.totalorder %s1798_s8, %s1220_s24 }
 0x1bc   : > { %p1223_p7 = scmp.lt.s32.totalorder %s1221_s27, %s1215_s19 }
 0x1be   : > { %p1224_p9 = por %p1223_p7, %p1222_p6 }
 0x1c0   : > { %p1225_p10 = pnand %p1224_p9, %p1218_p5 }
 0x1de   : > { %v838_v22 = vpop.permute.xlu1 %837 }
 0x1df   : > { %1060 = vst.msk [vmem:[%s1698_s14 + $0x18] sm:$0xff] %vm593_vm4, %v838_v22 }
 0x1e0   : > { %v836_v23 = vpop.permute.xlu0 %835 }
 0x1e1   : > { %1059 = vst.msk [vmem:[%s1698_s14 + $0x10] sm:$0xff] %vm593_vm4, %v836_v23 }
 0x1e2   : > { %v854_v2 = vpop.permute.xlu1 %853 }
 0x1e3   : > { %1068 = vst.msk [vmem:[%s1698_s14 + $0x98] sm:$0xff] %vm593_vm4, %v854_v2 }
 0x1e4   : > { %v852_v8 = vpop.permute.xlu0 %851 }
 0x1e5   : > { %1067 = vst.msk [vmem:[%s1698_s14 + $0x90] sm:$0xff] %vm593_vm4, %v852_v8 }
 0x1f6   : > { %v842_v24 = vpop.permute.xlu1 %841 }
 0x1f7   : > { %1062 = vst.msk [vmem:[%s1698_s14 + $0x38] sm:$0xff] %vm593_vm4, %v842_v24 }
 0x1f8   : > { %v840_v25 = vpop.permute.xlu0 %839 }
 0x1f9   : > { %1061 = vst.msk [vmem:[%s1698_s14 + $0x30] sm:$0xff] %vm593_vm4, %v840_v25 }
 0x1fa   : > { %v858_v26 = vpop.permute.xlu1 %857 }
 0x1fb   : > { %1070 = vst.msk [vmem:[%s1698_s14 + $0xb8] sm:$0xff] %vm593_vm4, %v858_v26 }
 0x1fc   : > { %v856_v47 = vpop.permute.xlu0 %855 }
 0x1fd   : > { %1069 = vst.msk [vmem:[%s1698_s14 + $0xb0] sm:$0xff] %vm593_vm4, %v856_v47 }
 0x20e   : > { %v846_v48 = vpop.permute.xlu1 %845 }
 0x20f   : > { %1064 = vst.msk [vmem:[%s1698_s14 + $0x58] sm:$0xff] %vm593_vm4, %v846_v48 }
 0x210   : > { %v844_v27 = vpop.permute.xlu0 %843 }
 0x211   : > { %1063 = vst.msk [vmem:[%s1698_s14 + $0x50] sm:$0xff] %vm593_vm4, %v844_v27 }
 0x212   : > { %v862_v28 = vpop.permute.xlu1 %861 }
 0x213   : > { %1072 = vst.msk [vmem:[%s1698_s14 + $0xd8] sm:$0xff] %vm593_vm4, %v862_v28 }
 0x214   : > { %v860_v29 = vpop.permute.xlu0 %859 }
 0x215   : > { %1071 = vst.msk [vmem:[%s1698_s14 + $0xd0] sm:$0xff] %vm593_vm4, %v860_v29 }
 0x226   : > { %v850_v30 = vpop.permute.xlu1 %849 }
 0x227   : > { %1066 = vst.msk [vmem:[%s1698_s14 + $0x78] sm:$0xff] %vm593_vm4, %v850_v30 }
 0x228   : > { %v848_v31 = vpop.permute.xlu0 %847 }
 0x229   : > { %1065 = vst.msk [vmem:[%s1698_s14 + $0x70] sm:$0xff] %vm593_vm4, %v848_v31 }
 0x22a   : > { %v866_v32 = vpop.permute.xlu1 %865 }
 0x22b   : > { %1074 = vst.msk [vmem:[%s1698_s14 + $0xf8] sm:$0xff] %vm593_vm4, %v866_v32 }
 0x22c   : > { %v864_v49 = vpop.permute.xlu0 %863 }
 0x22d   : > { %1073 = vst.msk [vmem:[%s1698_s14 + $0xf0] sm:$0xff] %vm593_vm4, %v864_v49 }
 0x22e   : > { %1228 = shalt.err (!%p1225_p10)
}
 0x22f   : > { %s1229_s5 = scalar_lea.hbm %s1794_s13, 4096  ;;  %s1233_s9 = scalar_lea.hbm %s1860_s4, 16384 }
 0x230   : > { %p1230_p11 = scmp.ne.s32.totalorder %s1794_s13, %s1229_s5  ;;  %p1234_p0 = scmp.lt.s32.totalorder %s1794_s13, %s1860_s4 }
 0x231   : > { %p1235_p1 = scmp.lt.s32.totalorder %s1233_s9, %s1229_s5 }
 0x232   : > { %p1231_p12 = pnand %p1230_p11, %p1391_p3 }
 0x233   : > { %p1236_p2 = por %p1235_p1, %p1234_p0 }
 0x234   : > { %p1232_p13 = pneg %p1231_p12 }
 0x236   : > { %p1237_p4 = pnand %p1236_p2, %p1232_p13 }
 0x238   : > { %1240 = shalt.err (!%p1237_p4)
}
 0x239   : > { %s1314_s12 = smov 128  }
 0x23a   : > { %1139 = dma.vmem_to_hbm [thread:$0]  (%p1391_p3), %s1798_s8, 4096, %s1794_s13, %s1804_s18, %s1314_s12, %s1314_s12, %s1866_s10  }
 0x23b PF: > { %p1145_p5 = scmp.ge.s32.totalorder %s1307_s22, 2  ;;  %s932_s19 = sand.u32 1, %s1279_s15  }
 0x23c   : > { %s933_s23 = scalar_lea.sflag [#allocation3], %s932_s19 }
 0x23d   : > { %p1142_p6 = pnand %p1145_p5, %p1400_p8 }
 0x23f   : > { %p1143_p7 = pneg %p1142_p6 }
 0x241   : > { %1274 = dma.done.wait (%p1143_p7), %s933_s23, 4096  }
 0x242   : > { %1276 = vsyncadd (%p1143_p7), %s933_s23, 4294963200  ;;  %s17_s22 = sadd.s32 1, %s1307_s22   ;;  %s1867_s15 = smov %s1283_s16 }
 0x243   : > { %p14_p9 = scmp.ge.s32.totalorder %s17_s22, 6   ;;  %s1868_s16 = smov %s1287_s17 }
 0x244   : > { %s1869_s17 = smov %s1409_s7  ;;  %s1870_s18 = smov %s1299_s20 }
 0x245   : > { %s1871_s19 = smov %s1303_s21  ;;  %s1872_s20 = smov %s1875_s25 }
 0x246   : > { %s1873_s21 = smov %s1879_s26  ;;  %16 = sbr.rel (!%p14_p9) target bundleno = 5 (0x5), region = 75 }
 0x24b   :  { %938 = vsyncpa [#allocation3], 1 }
 0x24c   :  { %940 = vsyncpa [#allocation3 + $0x1], 1 }

</bundles_post_ra>
